<compile_context>
chip_gen: v7x
topology: tpu7x:2x2x1
jax: 0.10.0
libtpu: 0.0.40
codegen_flags: <defaults>
</compile_context>

<pallas_src>
import numpy as np
import jax
import jax.numpy as jnp
from jax import lax
from jax.experimental import pallas as pl
from jax.experimental.pallas import tpu as pltpu

# Model dimensions (JointDQN with default input_shape=(8, 7, 7)).
N_BATCH = 2
C_IN, H_IN, W_IN = 8, 7, 7
KH = KW = 3
C_OUT = 16
H_CONV, W_CONV = H_IN - KH + 1, W_IN - KW + 1   # 5, 5
H_POOL, W_POOL = H_CONV // 2, W_CONV // 2       # 2, 2  (floor: row/col 4 dropped)
N_POOL = H_POOL * W_POOL                        # 4 pooled positions
N_WIN = 4                                       # 2x2 pooling window offsets
K_PATCH = KH * KW * C_IN                        # 72 im2col features per position
K_FUSED = N_POOL * K_PATCH                      # 288 fused-conv contraction dim
FEAT = C_OUT * N_POOL                           # 64  (== dqn_input_size)
HIDDEN = 64
NUM_ACTIONS = 6
OUT_PAD = 128                                   # lane-dense padded action dim
NEG_BIG = -1e30                                 # bias for padded softmax columns


def joint_dqn_kernel(p_ref, wconv_ref, bconv_ref, wfc1_ref, bfc1_ref,
                     wfc2_ref, bfc2_ref, out_ref):
    tb = out_ref.shape[0]                       # batch tile size (multiple of 8)

    # ---- Fused Conv2d: ONE MXU matmul (4*TB, 288) @ (288, 64) -------------
    # Rows are ordered (window offset, sample); output lanes are already in
    # (pool_i, pool_j, c_out) order thanks to the block-diagonal weight.
    conv = jnp.dot(p_ref[...], wconv_ref[...],
                   preferred_element_type=jnp.float32)          # (4*TB, 64)

    # ---- MaxPool2d(2): elementwise max over the 4 window-offset blocks ----
    m0 = jnp.maximum(conv[0 * tb:1 * tb], conv[1 * tb:2 * tb])
    m1 = jnp.maximum(conv[2 * tb:3 * tb], conv[3 * tb:4 * tb])
    # bias + ReLU commute with the max (same bias for all 4 offsets).
    feat = jnp.maximum(jnp.maximum(m0, m1) + bconv_ref[...], 0.0)  # (TB, 64)

    # ---- Linear(64 -> 64) + ReLU ----
    h1 = jnp.dot(feat, wfc1_ref[...], preferred_element_type=jnp.float32)
    h1 = jnp.maximum(h1 + bfc1_ref[...], 0.0)                      # (TB, 64)

    # ---- Linear(64 -> 6), padded to 128 lanes for unmasked stores ----
    logits = jnp.dot(h1, wfc2_ref[...], preferred_element_type=jnp.float32)
    logits = logits + bfc2_ref[...]                                # (TB, 128)

    # ---- Softmax(dim=1): padded columns have -1e30 bias -> contribute 0 ----
    m = jnp.max(logits, axis=-1, keepdims=True)
    e = jnp.exp(logits - m)
    inv = pl.reciprocal(jnp.sum(e, axis=-1, keepdims=True), approx=True)
    out_ref[...] = e * inv


def _im2col_pooled(x_nhwc):
    """(N,7,7,8) -> (N_WIN, N, 288): rows (win, n), lanes (pool_i, pool_j, kh, kw, c)."""
    n = x_nhwc.shape[0]
    # Tap (kh, kw) value at conv output positions h, w in 0..3 (only positions
    # that survive floor-mode MaxPool2d(2) on the 5x5 conv output).
    taps = [x_nhwc[:, kh:kh + 2 * H_POOL, kw:kw + 2 * W_POOL, :]
            for kh in range(KH) for kw in range(KW)]           # 9 x (N,4,4,8)
    patches = jnp.stack(taps, axis=3)                          # (N,4,4,9,8)
    patches = patches.reshape(n, 2 * H_POOL, 2 * W_POOL, K_PATCH)
    # split h -> (pool_i, di), w -> (pool_j, dj)
    p6 = patches.reshape(n, H_POOL, 2, W_POOL, 2, K_PATCH)
    p6 = jnp.transpose(p6, (2, 4, 0, 1, 3, 5))                 # (di,dj,n,pi,pj,f)
    return p6.reshape(N_WIN, n, K_FUSED)


def joint_dqn_forward(x_nchw, params, max_tb=256):
    """PyTorch-layout params + NCHW input -> Pallas kernel call."""
    w_conv, b_conv, w_fc1, b_fc1, w_fc2, b_fc2 = params
    n = x_nchw.shape[0]

    # Batch tile: multiple of 8 (sublane aligned), capped at max_tb.
    tb = min(max_tb, max(8, ((n + 7) // 8) * 8))
    n_pad = ((n + tb - 1) // tb) * tb
    n_tiles = n_pad // tb

    # NCHW -> NHWC, im2col in the wrapper (XLA layout plumbing, not kernel work).
    x = jnp.transpose(x_nchw, (0, 2, 3, 1)).astype(jnp.float32)
    p3 = _im2col_pooled(x)                                     # (4, N, 288)
    if n_pad != n:
        p3 = jnp.pad(p3, ((0, 0), (0, n_pad - n), (0, 0)))
    # Reorder rows to (tile, win, row-in-tile) so each grid step reads one
    # contiguous (4*tb, 288) block.
    p2 = p3.reshape(N_WIN, n_tiles, tb, K_FUSED)
    p2 = jnp.transpose(p2, (1, 0, 2, 3)).reshape(n_pad * N_WIN, K_FUSED)

    # Conv weight (O, C, kh, kw) -> (72, 16), then block-diagonal (288, 64):
    # block p maps pool-position p's 72 patch features to channels [16p, 16p+16).
    w72 = jnp.transpose(w_conv, (2, 3, 1, 0)).reshape(K_PATCH, C_OUT)
    w72 = w72.astype(jnp.float32)
    wconv_k = jnp.zeros((K_FUSED, FEAT), jnp.float32)
    for p in range(N_POOL):
        wconv_k = wconv_k.at[p * K_PATCH:(p + 1) * K_PATCH,
                             p * C_OUT:(p + 1) * C_OUT].set(w72)
    bconv_k = jnp.tile(b_conv.astype(jnp.float32), N_POOL).reshape(1, FEAT)

    # FC1: remap kernel (pool_i, pool_j, c) feature order to PyTorch
    # Flatten() (c, pool_i, pool_j) order so semantics match exactly.
    perm = np.array([c * N_POOL + pi * W_POOL + pj
                     for pi in range(H_POOL)
                     for pj in range(W_POOL)
                     for c in range(C_OUT)], dtype=np.int32)
    wfc1_k = jnp.transpose(w_fc1[:, perm]).astype(jnp.float32)   # (64_in, 64_out)
    bfc1_k = b_fc1.reshape(1, HIDDEN).astype(jnp.float32)

    # FC2 padded to 128 output lanes; padded columns get -1e30 bias so they
    # are exactly 0 after softmax.
    wfc2_k = jnp.zeros((HIDDEN, OUT_PAD), jnp.float32)
    wfc2_k = wfc2_k.at[:, :NUM_ACTIONS].set(jnp.transpose(w_fc2).astype(jnp.float32))
    bfc2_k = jnp.full((1, OUT_PAD), NEG_BIG, jnp.float32)
    bfc2_k = bfc2_k.at[0, :NUM_ACTIONS].set(b_fc2.astype(jnp.float32))

    def const2d(shape):
        return pl.BlockSpec(shape, lambda i: (0, 0))

    out_pad = pl.pallas_call(
        joint_dqn_kernel,
        out_shape=jax.ShapeDtypeStruct((n_pad, OUT_PAD), jnp.float32),
        grid=(n_tiles,),
        in_specs=[
            pl.BlockSpec((N_WIN * tb, K_FUSED), lambda i: (i, 0)),  # patches
            const2d((K_FUSED, FEAT)),       # conv weight (block-diag)
            const2d((1, FEAT)),             # conv bias (tiled x4)
            const2d((FEAT, HIDDEN)),        # fc1 weight
            const2d((1, HIDDEN)),           # fc1 bias
            const2d((HIDDEN, OUT_PAD)),     # fc2 weight (lane-padded)
            const2d((1, OUT_PAD)),          # fc2 bias (lane-padded)
        ],
        out_specs=pl.BlockSpec((tb, OUT_PAD), lambda i: (i, 0)),
        compiler_params=pltpu.CompilerParams(
            dimension_semantics=("parallel",)),
    )(p2, wconv_k, bconv_k, wfc1_k, bfc1_k, wfc2_k, bfc2_k)

    return out_pad[:n, :NUM_ACTIONS]


def joint_dqn_reference(x_nchw, params):
    """Pure-JAX reference mirroring the PyTorch module (for validation)."""
    w_conv, b_conv, w_fc1, b_fc1, w_fc2, b_fc2 = params
    conv = lax.conv_general_dilated(
        x_nchw, w_conv, window_strides=(1, 1), padding="VALID",
        dimension_numbers=("NCHW", "OIHW", "NCHW"))
    conv = jnp.maximum(conv + b_conv[None, :, None, None], 0.0)
    pooled = lax.reduce_window(conv, -jnp.inf, lax.max,
                               (1, 1, 2, 2), (1, 1, 2, 2), "VALID")
    feat = pooled.reshape(x_nchw.shape[0], -1)       # (N, 64) in (c, h, w) order
    h1 = jnp.maximum(feat @ w_fc1.T + b_fc1, 0.0)
    logits = h1 @ w_fc2.T + b_fc2
    return jax.nn.softmax(logits, axis=1)


if __name__ == "__main__":
    key = jax.random.PRNGKey(0)
    kx, k1, k2, k3, k4, k5, k6 = jax.random.split(key, 7)

    # PyTorch NCHW input: (batch=2, channels=8, 7, 7)
    x = jax.random.normal(kx, (N_BATCH, C_IN, H_IN, W_IN), jnp.float32)

    # Deterministic synthetic parameters (PyTorch tensor layouts).
    params = (
        0.1 * jax.random.normal(k1, (C_OUT, C_IN, KH, KW), jnp.float32),  # conv.weight
        0.1 * jax.random.normal(k2, (C_OUT,), jnp.float32),               # conv.bias
        0.1 * jax.random.normal(k3, (HIDDEN, FEAT), jnp.float32),         # fc1.weight
        0.1 * jax.random.normal(k4, (HIDDEN,), jnp.float32),              # fc1.bias
        0.1 * jax.random.normal(k5, (NUM_ACTIONS, HIDDEN), jnp.float32),  # fc2.weight
        0.1 * jax.random.normal(k6, (NUM_ACTIONS,), jnp.float32),         # fc2.bias
    )

    # Tolerance 2e-3: softmax uses the EUP approximate reciprocal (exact
    # otherwise); layout/permutation bugs would be orders of magnitude larger.
    out = jax.block_until_ready(joint_dqn_forward(x, params))
    ref = jax.block_until_ready(joint_dqn_reference(x, params))
    assert out.shape == (N_BATCH, NUM_ACTIONS)
    np.testing.assert_allclose(np.asarray(out), np.asarray(ref),
                               rtol=2e-3, atol=2e-3)

    # Also exercise the batch grid (multiple tiles + padding path).
    xb = jax.random.normal(jax.random.PRNGKey(1), (300, C_IN, H_IN, W_IN),
                           jnp.float32)
    out_b = jax.block_until_ready(joint_dqn_forward(xb, params))
    ref_b = jax.block_until_ready(joint_dqn_reference(xb, params))
    assert out_b.shape == (300, NUM_ACTIONS)
    np.testing.assert_allclose(np.asarray(out_b), np.asarray(ref_b),
                               rtol=2e-3, atol=2e-3)

    print("KERNEL_OK")
</pallas_src>

<mosaic_0001>
module attributes {stable_mosaic.version = 11 : i64} {
  func.func @joint_dqn_kernel(%arg0: i32, %arg1: memref<32x288xf32, #tpu.memory_space<vmem>>, %arg2: memref<288x64xf32, #tpu.memory_space<vmem>>, %arg3: memref<1x64xf32, #tpu.memory_space<vmem>>, %arg4: memref<64x64xf32, #tpu.memory_space<vmem>>, %arg5: memref<1x64xf32, #tpu.memory_space<vmem>>, %arg6: memref<64x128xf32, #tpu.memory_space<vmem>>, %arg7: memref<1x128xf32, #tpu.memory_space<vmem>>, %arg8: memref<8x128xf32, #tpu.memory_space<vmem>>) attributes {dimension_semantics = [#tpu.dimension_semantics<parallel>], iteration_bounds = array<i64: 1>, scalar_prefetch = 0 : i64, scratch_operands = 0 : i64, tpu.core_type = #tpu.core_type<tc>, window_params = [{transform_indices = @transform_0, window_bounds = array<i64: 32, 288>}, {pipeline_mode = #tpu.pipeline_mode<synchronous>, transform_indices = @transform_1, window_bounds = array<i64: 288, 64>}, {pipeline_mode = #tpu.pipeline_mode<synchronous>, transform_indices = @transform_2, window_bounds = array<i64: 1, 64>}, {pipeline_mode = #tpu.pipeline_mode<synchronous>, transform_indices = @transform_3, window_bounds = array<i64: 64, 64>}, {pipeline_mode = #tpu.pipeline_mode<synchronous>, transform_indices = @transform_4, window_bounds = array<i64: 1, 64>}, {pipeline_mode = #tpu.pipeline_mode<synchronous>, transform_indices = @transform_5, window_bounds = array<i64: 64, 128>}, {pipeline_mode = #tpu.pipeline_mode<synchronous>, transform_indices = @transform_6, window_bounds = array<i64: 1, 128>}, {transform_indices = @transform_7, window_bounds = array<i64: 8, 128>}]} {
    %c0 = arith.constant 0 : index
    %c0_0 = arith.constant 0 : index
    %0 = vector.load %arg1[%c0, %c0_0] : memref<32x288xf32, #tpu.memory_space<vmem>>, vector<32x288xf32>
    %c0_1 = arith.constant 0 : index
    %c0_2 = arith.constant 0 : index
    %1 = vector.load %arg2[%c0_1, %c0_2] : memref<288x64xf32, #tpu.memory_space<vmem>>, vector<288x64xf32>
    %cst = arith.constant dense<0.000000e+00> : vector<32x64xf32>
    %2 = tpu.matmul %0, %1, %cst {dimension_numbers = #tpu.dot_dimension_numbers<[1], [0], [0], [1], [0, 0, 1, 1], [], []>} : vector<32x288xf32>, vector<288x64xf32>, vector<32x64xf32> -> vector<32x64xf32>
    %3 = vector.extract_strided_slice %2 {offsets = [0, 0], sizes = [8, 64], strides = [1, 1]} : vector<32x64xf32> to vector<8x64xf32>
    %4 = vector.extract_strided_slice %2 {offsets = [8, 0], sizes = [8, 64], strides = [1, 1]} : vector<32x64xf32> to vector<8x64xf32>
    %5 = arith.maximumf %3, %4 : vector<8x64xf32>
    %6 = vector.extract_strided_slice %2 {offsets = [16, 0], sizes = [8, 64], strides = [1, 1]} : vector<32x64xf32> to vector<8x64xf32>
    %7 = vector.extract_strided_slice %2 {offsets = [24, 0], sizes = [8, 64], strides = [1, 1]} : vector<32x64xf32> to vector<8x64xf32>
    %8 = arith.maximumf %6, %7 : vector<8x64xf32>
    %9 = arith.maximumf %5, %8 : vector<8x64xf32>
    %c0_3 = arith.constant 0 : index
    %c0_4 = arith.constant 0 : index
    %10 = vector.load %arg3[%c0_3, %c0_4] : memref<1x64xf32, #tpu.memory_space<vmem>>, vector<1x64xf32>
    %11 = vector.broadcast %10 : vector<1x64xf32> to vector<8x64xf32>
    %12 = arith.addf %9, %11 : vector<8x64xf32>
    %cst_5 = arith.constant 0.000000e+00 : f32
    %13 = vector.broadcast %cst_5 : f32 to vector<8x64xf32>
    %14 = arith.maximumf %12, %13 : vector<8x64xf32>
    %c0_6 = arith.constant 0 : index
    %c0_7 = arith.constant 0 : index
    %15 = vector.load %arg4[%c0_6, %c0_7] : memref<64x64xf32, #tpu.memory_space<vmem>>, vector<64x64xf32>
    %cst_8 = arith.constant dense<0.000000e+00> : vector<8x64xf32>
    %16 = tpu.matmul %14, %15, %cst_8 {dimension_numbers = #tpu.dot_dimension_numbers<[1], [0], [0], [1], [0, 0, 1, 1], [], []>} : vector<8x64xf32>, vector<64x64xf32>, vector<8x64xf32> -> vector<8x64xf32>
    %c0_9 = arith.constant 0 : index
    %c0_10 = arith.constant 0 : index
    %17 = vector.load %arg5[%c0_9, %c0_10] : memref<1x64xf32, #tpu.memory_space<vmem>>, vector<1x64xf32>
    %18 = vector.broadcast %17 : vector<1x64xf32> to vector<8x64xf32>
    %19 = arith.addf %16, %18 : vector<8x64xf32>
    %cst_11 = arith.constant 0.000000e+00 : f32
    %20 = vector.broadcast %cst_11 : f32 to vector<8x64xf32>
    %21 = arith.maximumf %19, %20 : vector<8x64xf32>
    %c0_12 = arith.constant 0 : index
    %c0_13 = arith.constant 0 : index
    %22 = vector.load %arg6[%c0_12, %c0_13] : memref<64x128xf32, #tpu.memory_space<vmem>>, vector<64x128xf32>
    %cst_14 = arith.constant dense<0.000000e+00> : vector<8x128xf32>
    %23 = tpu.matmul %21, %22, %cst_14 {dimension_numbers = #tpu.dot_dimension_numbers<[1], [0], [0], [1], [0, 0, 1, 1], [], []>} : vector<8x64xf32>, vector<64x128xf32>, vector<8x128xf32> -> vector<8x128xf32>
    %c0_15 = arith.constant 0 : index
    %c0_16 = arith.constant 0 : index
    %24 = vector.load %arg7[%c0_15, %c0_16] : memref<1x128xf32, #tpu.memory_space<vmem>>, vector<1x128xf32>
    %25 = vector.broadcast %24 : vector<1x128xf32> to vector<8x128xf32>
    %26 = arith.addf %23, %25 : vector<8x128xf32>
    %cst_17 = arith.constant dense<0xFF800000> : vector<8xf32>
    %27 = vector.multi_reduction <maximumf>, %26, %cst_17 [1] : vector<8x128xf32> to vector<8xf32>
    %28 = vector.shape_cast %27 : vector<8xf32> to vector<8x1xf32>
    %29 = vector.broadcast %28 : vector<8x1xf32> to vector<8x128xf32>
    %30 = arith.subf %26, %29 : vector<8x128xf32>
    %31 = math.exp %30 : vector<8x128xf32>
    %cst_18 = arith.constant dense<0.000000e+00> : vector<8xf32>
    %32 = vector.multi_reduction <add>, %31, %cst_18 [1] : vector<8x128xf32> to vector<8xf32>
    %33 = vector.shape_cast %32 : vector<8xf32> to vector<8x1xf32>
    %34 = tpu.reciprocal %33 {approx = true} : vector<8x1xf32> -> vector<8x1xf32>
    %35 = vector.broadcast %34 : vector<8x1xf32> to vector<8x128xf32>
    %36 = arith.mulf %31, %35 : vector<8x128xf32>
    %c0_19 = arith.constant 0 : index
    %c0_20 = arith.constant 0 : index
    %37 = vector.load %arg8[%c0_19, %c0_20] : memref<8x128xf32, #tpu.memory_space<vmem>>, vector<8x128xf32>
    tpu.vector_store %arg8[%c0_19, %c0_20], %36 {strides = array<i32>} : memref<8x128xf32, #tpu.memory_space<vmem>>, vector<8x128xf32>,
    return
  }
  func.func @transform_0(%arg0: i32) -> (i32, i32) {
    %c0_i32 = arith.constant 0 : i32
    %c0_i32_0 = arith.constant 0 : i32
    return %arg0, %c0_i32 : i32, i32
  }
  func.func @transform_1(%arg0: i32) -> (i32, i32) {
    %c0_i32 = arith.constant 0 : i32
    %c0_i32_0 = arith.constant 0 : i32
    %c0_i32_1 = arith.constant 0 : i32
    return %c0_i32, %c0_i32_0 : i32, i32
  }
  func.func @transform_2(%arg0: i32) -> (i32, i32) {
    %c0_i32 = arith.constant 0 : i32
    %c0_i32_0 = arith.constant 0 : i32
    %c0_i32_1 = arith.constant 0 : i32
    return %c0_i32, %c0_i32_0 : i32, i32
  }
  func.func @transform_3(%arg0: i32) -> (i32, i32) {
    %c0_i32 = arith.constant 0 : i32
    %c0_i32_0 = arith.constant 0 : i32
    %c0_i32_1 = arith.constant 0 : i32
    return %c0_i32, %c0_i32_0 : i32, i32
  }
  func.func @transform_4(%arg0: i32) -> (i32, i32) {
    %c0_i32 = arith.constant 0 : i32
    %c0_i32_0 = arith.constant 0 : i32
    %c0_i32_1 = arith.constant 0 : i32
    return %c0_i32, %c0_i32_0 : i32, i32
  }
  func.func @transform_5(%arg0: i32) -> (i32, i32) {
    %c0_i32 = arith.constant 0 : i32
    %c0_i32_0 = arith.constant 0 : i32
    %c0_i32_1 = arith.constant 0 : i32
    return %c0_i32, %c0_i32_0 : i32, i32
  }
  func.func @transform_6(%arg0: i32) -> (i32, i32) {
    %c0_i32 = arith.constant 0 : i32
    %c0_i32_0 = arith.constant 0 : i32
    %c0_i32_1 = arith.constant 0 : i32
    return %c0_i32, %c0_i32_0 : i32, i32
  }
  func.func @transform_7(%arg0: i32) -> (i32, i32) {
    %c0_i32 = arith.constant 0 : i32
    %c0_i32_0 = arith.constant 0 : i32
    return %arg0, %c0_i32 : i32, i32
  }
}

</mosaic_0001>

<bundles_post_ra>
// kernel: tpu_custom_call.1
= control target key start
LH: loop header
LB: loop body
LE: loop exit
PB: predicated region body
PF: predicated region fallthrough
CT: control target
= control target key end

     0   :  { %vm75_vm0 = vcmask 261120   ;;  %s972_s0 = inlined_call_operand.vmem [shape: f32[32,288], index: 0, kind: input, shape index: {}]   ;;  %s973_s1 = inlined_call_operand.vmem [shape: f32[288,64], index: 1, kind: input, shape index: {}]   ;;  %s974_s2 = inlined_call_operand.vmem [shape: f32[1,64], index: 2, kind: input, shape index: {}]   ;;  %s975_s3 = inlined_call_operand.vmem [shape: f32[64,64], index: 3, kind: input, shape index: {}]   ;;  %s976_s4 = inlined_call_operand.vmem [shape: f32[1,64], index: 4, kind: input, shape index: {}]   ;;  %s977_s5 = inlined_call_operand.vmem [shape: f32[64,128], index: 5, kind: input, shape index: {}]   ;;  %s978_s6 = inlined_call_operand.vmem [shape: f32[1,128], index: 6, kind: input, shape index: {}]   ;;  %s979_s7 = inlined_call_operand.hbm [shape: f32[8,128], index: 7, kind: output, shape index: {}]  }
   0x1   :  { %v55_v0 = vld [vmem:[%s973_s1 + $0x80] sm:$0xff]  ;;  %v56_v1 = vld [vmem:[%s973_s1 + $0x88] sm:$0xff]  ;;  %v57_v5 = vld [vmem:[%s973_s1 + $0x90] sm:$0xff] }
   0x2   :  { %v39_v2 = vld [vmem:[%s973_s1] sm:$0xff]  ;;  %v603_v3 = vpack.c.bf16 %v56_v1, %v55_v0  ;;  %v40_v4 = vld [vmem:[%s973_s1 + $0x8] sm:$0xff]  ;;  %v58_v6 = vld [vmem:[%s973_s1 + $0x98] sm:$0xff] }
   0x3   :  { %v605_v7 = vpack.c.bf16 %v40_v4, %v39_v2  ;;  %v607_v8 = vpack.c.bf16 %v58_v6, %v57_v5  ;;  %v41_v9 = vld [vmem:[%s973_s1 + $0x10] sm:$0xff]  ;;  %v42_v10 = vld [vmem:[%s973_s1 + $0x18] sm:$0xff]  ;;  %v59_v11 = vld [vmem:[%s973_s1 + $0xa0] sm:$0xff] }
   0x4   :  { %604 = vmatprep.subr.bf16.mxu0 %v603_v3  ;;  %v60_v12 = vld [vmem:[%s973_s1 + $0xa8] sm:$0xff]  ;;  %v609_v13 = vpack.c.bf16 %v42_v10, %v41_v9  ;;  %v43_v15 = vld [vmem:[%s973_s1 + $0x20] sm:$0xff]  ;;  %v61_v17 = vld [vmem:[%s973_s1 + $0xb0] sm:$0xff] }
   0x5   :  { %606 = vmatpush3.bf16.msra.mxu0 %v605_v7  ;;  %v611_v14 = vpack.c.bf16 %v60_v12, %v59_v11  ;;  %v44_v16 = vld [vmem:[%s973_s1 + $0x28] sm:$0xff]  ;;  %v62_v18 = vld [vmem:[%s973_s1 + $0xb8] sm:$0xff]  ;;  %v45_v20 = vld [vmem:[%s973_s1 + $0x30] sm:$0xff] }
   0x6   :  { %608 = vmatprep.subr.bf16.mxu0 %v607_v8  ;;  %v613_v19 = vpack.c.bf16 %v44_v16, %v43_v15  ;;  %v615_v21 = vpack.c.bf16 %v62_v18, %v61_v17  ;;  %v46_v22 = vld [vmem:[%s973_s1 + $0x38] sm:$0xff]  ;;  %v71_v23 = vld [vmem:[%s973_s1 + $0x100] sm:$0xff]  ;;  %v72_v24 = vld [vmem:[%s973_s1 + $0x108] sm:$0xff] }
   0x7   :  { %v63_v25 = vld [vmem:[%s973_s1 + $0xc0] sm:$0xff]  ;;  %v64_v26 = vld [vmem:[%s973_s1 + $0xc8] sm:$0xff]  ;;  %v635_v27 = vpack.c.bf16 %v72_v24, %v71_v23  ;;  %v73_v28 = vld [vmem:[%s973_s1 + $0x110] sm:$0xff]  ;;  %v617_v30 = vpack.c.bf16 %v46_v22, %v45_v20 }
   0x8   :  { %v74_v29 = vld [vmem:[%s973_s1 + $0x118] sm:$0xff]  ;;  %v28_v32 = vld [vmem:[%s972_s0 + $0x8] sm:$0xff]  ;;  %v29_v33 = vld [vmem:[%s972_s0 + $0x10] sm:$0xff]  ;;  %v619_v34 = vpack.c.bf16 %v64_v26, %v63_v25 }
   0x9   :  { %610 = vmatpush3.bf16.msra.mxu0 %v609_v13  ;;  %636 = vmatprep.subr.bf16.mxu1 %v635_v27  ;;  %v639_v31 = vpack.c.bf16 %v74_v29, %v73_v28  ;;  %v47_v35 = vld [vmem:[%s973_s1 + $0x40] sm:$0xff]  ;;  %v48_v36 = vld [vmem:[%s973_s1 + $0x48] sm:$0xff]  ;;  %v65_v37 = vld [vmem:[%s973_s1 + $0xd0] sm:$0xff] }
   0xa   :  { %612 = vmatprep.subr.bf16.mxu0 %v611_v14  ;;  %638 = vmatpush3.bf16.msra.mxu1 %v635_v27  ;;  %v66_v38 = vld [vmem:[%s973_s1 + $0xd8] sm:$0xff]  ;;  %v621_v39 = vpack.c.bf16 %v48_v36, %v47_v35 }
   0xb   :  { %640 = vmatprep.subr.bf16.mxu1 %v639_v31  ;;  %152 = vmatprep.mubr.f32.mxu0 %v28_v32 }
   0xc   :  { %559 = vmatprep.mubr.msk.f32.mxu1 %vm75_vm0, %v29_v33 }
   0xd   :  { %614 = vmatpush3.bf16.msra.mxu0 %v613_v19 }
   0xe   :  { %616 = vmatprep.subr.bf16.mxu0 %v615_v21 }
  0x11   :  { %618 = vmatpush3.bf16.msra.mxu0 %v617_v30 }
  0x12   :  { %12 = vsyncpa [#allocation3], 0  ;;  %620 = vmatprep.subr.bf16.mxu0 %v619_v34  ;;  %v623_v40 = vpack.c.bf16 %v66_v38, %v65_v37  ;;  %v49_v41 = vld [vmem:[%s973_s1 + $0x50] sm:$0xff]  ;;  %v50_v42 = vld [vmem:[%s973_s1 + $0x58] sm:$0xff]  ;;  %642 = vmatpush3.bf16.msra.mxu1 %v639_v31  ;;  %v699_v5 = vmov 0.0|0.0   ;;  %vm700_vm1 = vmmov 0  }
  0x13   :  { %v32_v43 = vld [vmem:[%s972_s0 + $0x28] sm:$0xff]  ;;  %v67_v44 = vld [vmem:[%s973_s1 + $0xe0] sm:$0xff]  ;;  %v625_v47 = vpack.c.bf16 %v50_v42, %v49_v41  ;;  %v38_v51 = vld [vmem:[%s972_s0 + $0x58] sm:$0xff]  ;;  %643 = vmatprep.subr.bf16.mxu1 %v699_v5  ;;  %v701_v15 = vmov 0.0   ;;  %vm285_vm2 = vcmask 523264  }
  0x14   :  { %v68_v45 = vld [vmem:[%s973_s1 + $0xe8] sm:$0xff]  ;;  %v35_v46 = vld [vmem:[%s972_s0 + $0x40] sm:$0xff]  ;;  %v69_v52 = vld [vmem:[%s973_s1 + $0xf0] sm:$0xff] }
  0x15   :  { %622 = vmatpush3.bf16.msra.mxu0 %v621_v39  ;;  %560 = vmatmul.mubr.msk.f32.vlgmr.msra.gmra.mrb[0].mxu1 %vm75_vm0, %v32_v43  ;;  %v627_v48 = vpack.c.bf16 %v68_v45, %v67_v44  ;;  %v51_v49 = vld [vmem:[%s973_s1 + $0x60] sm:$0xff]  ;;  %v52_v50 = vld [vmem:[%s973_s1 + $0x68] sm:$0xff]  ;;  %v70_v53 = vld [vmem:[%s973_s1 + $0xf8] sm:$0xff] }
  0x16   :  { %624 = vmatprep.subr.bf16.mxu0 %v623_v40  ;;  %562 = vmatprep.mubr.msk.f32.mxu1 %vm75_vm0, %v35_v46  ;;  %v629_v54 = vpack.c.bf16 %v52_v50, %v51_v49  ;;  %v631_v55 = vpack.c.bf16 %v70_v53, %v69_v52  ;;  %v53_v56 = vld [vmem:[%s973_s1 + $0x70] sm:$0xff]  ;;  %v54_v57 = vld [vmem:[%s973_s1 + $0x78] sm:$0xff]  ;;  %v27_v59 = vld [vmem:[%s972_s0] sm:$0xff] }
  0x17   :  { %v633_v58 = vpack.c.bf16 %v54_v57, %v53_v56  ;;  %v31_v60 = vld [vmem:[%s972_s0 + $0x20] sm:$0xff]  ;;  %v30_v61 = vld [vmem:[%s972_s0 + $0x18] sm:$0xff]  ;;  %v33_v63 = vld [vmem:[%s972_s0 + $0x30] sm:$0xff] }
  0x18   :  { %v34_v62 = vld [vmem:[%s972_s0 + $0x38] sm:$0xff]  ;;  %v37_v0 = vld [vmem:[%s972_s0 + $0x50] sm:$0xff]  ;;  %v36_v1 = vld [vmem:[%s972_s0 + $0x48] sm:$0xff] }
  0x19   :  { %626 = vmatpush3.bf16.msra.mxu0 %v625_v47  ;;  %563 = vmatmul.mubr.msk.f32.gmra.mrb[2].mxu1 %vm75_vm0, %v38_v51  ;;  %v270_v2 = vld [vmem:[%s975_s3] sm:$0xff]  ;;  %v271_v3 = vld [vmem:[%s975_s3 + $0x8] sm:$0xff]  ;;  %v272_v6 = vld [vmem:[%s975_s3 + $0x10] sm:$0xff] }
  0x1a   :  { %628 = vmatprep.subr.bf16.mxu0 %v627_v48  ;;  %v644_v4 = vpack.c.bf16 %v271_v3, %v270_v2  ;;  %v273_v7 = vld [vmem:[%s975_s3 + $0x18] sm:$0xff]  ;;  %v274_v9 = vld [vmem:[%s975_s3 + $0x20] sm:$0xff]  ;;  %v275_v10 = vld [vmem:[%s975_s3 + $0x28] sm:$0xff]  ;;  %581 = vmatprep.mubr.msk.f32.mxu1 %vm700_vm1, %v701_v15 }
  0x1b   :  { %v647_v8 = vpack.c.bf16 %v273_v7, %v272_v6  ;;  %v650_v11 = vpack.c.bf16 %v275_v10, %v274_v9  ;;  %v276_v12 = vld [vmem:[%s975_s3 + $0x30] sm:$0xff]  ;;  %v277_v13 = vld [vmem:[%s975_s3 + $0x38] sm:$0xff]  ;;  %v476_v38 = vld [vmem:[%s974_s2] ss:$0 sm:$0xff] }
  0x1c   :  { %645 = vmatpush3.bf16.msra.mxu1 %v644_v4  ;;  %v653_v14 = vpack.c.bf16 %v277_v13, %v276_v12  ;;  %v360_v40 = vld [vmem:[%s977_s5] sm:$0xff]  ;;  %v361_v41 = vld [vmem:[%s977_s5 + $0x8] sm:$0xff]  ;;  %v362_v45 = vld [vmem:[%s977_s5 + $0x10] sm:$0xff] }
  0x1d   :  { %630 = vmatpush3.bf16.msra.mxu0 %v629_v54  ;;  %646 = vmatprep.subr.bf16.mxu1 %v699_v5  ;;  %v656_v43 = vpack.c.bf16 %v361_v41, %v360_v40  ;;  %v363_v46 = vld [vmem:[%s977_s5 + $0x18] sm:$0xff]  ;;  %v364_v48 = vld [vmem:[%s977_s5 + $0x20] sm:$0xff]  ;;  %v365_v49 = vld [vmem:[%s977_s5 + $0x28] sm:$0xff] }
  0x1e   :  { %632 = vmatprep.subr.bf16.mxu0 %v631_v55  ;;  %v659_v47 = vpack.c.bf16 %v363_v46, %v362_v45  ;;  %v662_v50 = vpack.c.bf16 %v365_v49, %v364_v48  ;;  %v366_v51 = vld [vmem:[%s977_s5 + $0x30] sm:$0xff]  ;;  %v367_v52 = vld [vmem:[%s977_s5 + $0x38] sm:$0xff]  ;;  %v477_v54 = vld [vmem:[%s976_s4] ss:$0 sm:$0xff]  ;;  %s702_s4 = smov [#allocation2]  }
  0x1f   :  { %v665_v53 = vpack.c.bf16 %v367_v52, %v366_v51  ;;  %s464_s5 = sshll.u32 %s702_s4, 4  ;;  %s465_s5 = int_to_ptr.vmem [resolvable:$true] %s464_s5 }
  0x20   :  { %648 = vmatpush3.bf16.msra.mxu1 %v647_v8  ;;  %s675_s14 = scalar_lea.vmem %s465_s5, 128  ;;  %p680_p1 = scmp.lt.s32.totalorder %s465_s5, %s465_s5 }
  0x21   :  { %634 = vmatpush3.bf16.msra.mxu0 %v633_v58  ;;  %649 = vmatprep.subr.bf16.mxu1 %v699_v5  ;;  %p676_p0 = scmp.ne.s32.totalorder %s465_s5, %s675_s14  ;;  %p681_p2 = scmp.lt.s32.totalorder %s675_s14, %s675_s14 }
  0x23   :  { %p682_p3 = por %p681_p2, %p680_p1 }
  0x24   :  { %153 = vmatmul.mubr.f32.vlgmr.msra.gmra.mrb[0].mxu0 %v27_v59  ;;  %651 = vmatpush3.bf16.msra.mxu1 %v650_v11  ;;  %v479_v59 = vld [vmem:[%s978_s6] ss:$0 sm:$0xff] }
  0x25   :  { %157 = vmatprep.mubr.f32.mxu0 %v31_v60  ;;  %652 = vmatprep.subr.bf16.mxu1 %v699_v5  ;;  %p683_p4 = pnand %p682_p3, %p676_p0 }
  0x28   :  { %158 = vmatmul.mubr.f32.gmra.mrb[2].mxu0 %v30_v61  ;;  %654 = vmatpush3.bf16.msra.mxu1 %v653_v14 }
  0x29   :  { %162 = vmatprep.mubr.f32.mxu0 %v34_v62  ;;  %655 = vmatprep.subr.bf16.mxu1 %v699_v5 }
  0x2c   :  { %163 = vmatmul.mubr.f32.gmra.mrb[4].mxu0 %v33_v63 }
  0x2d   :  { %167 = vmatprep.mubr.f32.mxu0 %v37_v0 }
  0x30   :  { %168 = vmatmul.mubr.f32.gmra.mrb[6].mxu0 %v36_v1 }
  0xe8   :  { %v561_v16 = vpop.f32.mrb[0].mxu1 }
  0xe9   :  { %v239_v17 = vpop.f32.mrb[1].mxu1 }
  0xec   :  { %v564_v18 = vpop.f32.mrb[2].mxu1 }
  0xed   :  { %v249_v19 = vpop.f32.mrb[3].mxu1 }
  0xf7   :  { %v513_v20 = vpop.f32.mrb[0].mxu0 }
  0xf8   :  { %v514_v21 = vpop.f32.mrb[1].mxu0 }
  0xf9   :  { %v515_v22 = vadd.f32 %v514_v21, %v513_v20 }
  0xfb   :  { %v240_v23 = vadd.f32 %v515_v22, %v239_v17  ;;  %v516_v24 = vpop.f32.mrb[2].mxu0 }
  0xfc   :  { %v517_v25 = vpop.f32.mrb[3].mxu0 }
  0xfd   :  { %v518_v26 = vadd.f32 %v517_v25, %v516_v24 }
  0xff   :  { %v245_v27 = vadd.f32 %v561_v16, %v518_v26  ;;  %v519_v28 = vpop.f32.mrb[4].mxu0 }
 0x100   :  { %v520_v29 = vpop.f32.mrb[5].mxu0 }
 0x101   :  { %v258_v30 = vmax.f32 %v240_v23, %v245_v27  ;;  %v521_v31 = vadd.f32 %v520_v29, %v519_v28 }
 0x103   :  { %v250_v32 = vadd.f32 %v521_v31, %v249_v19  ;;  %v522_v33 = vpop.f32.mrb[6].mxu0 }
 0x104   :  { %v523_v34 = vpop.f32.mrb[7].mxu0 }
 0x105   :  { %v524_v35 = vadd.f32 %v523_v34, %v522_v33 }
 0x107   :  { %v255_v36 = vadd.f32 %v564_v18, %v524_v35 }
 0x109   :  { %v259_v37 = vmax.f32 %v250_v32, %v255_v36 }
 0x10b   :  { %v260_v39 = vmax.f32 %v258_v30, %v259_v37 }
 0x10d   :  { %v268_v42 = vadd.f32 %v476_v38, %v260_v39 }
 0x10f   :  { %v269_v44 = vmax.f32 %v268_v42, 0.0 }
 0x111   :  { %582 = vmatmul.mubr.msk.f32.vlgmr.msra.gmra.mrb[4].mxu1 %vm285_vm2, %v269_v44 }
 0x112   :  { %657 = vmatpush3.bf16.msra.mxu1 %v656_v43  ;;  %600 = vmatprep.mubr.msk.f32.mxu1 %vm700_vm1, %v701_v15 }
 0x113   :  { %658 = vmatprep.subr.bf16.mxu1 %v699_v5 }
 0x116   :  { %660 = vmatpush3.bf16.msra.mxu1 %v659_v47 }
 0x117   :  { %661 = vmatprep.subr.bf16.mxu1 %v699_v5 }
 0x11a   :  { %663 = vmatpush3.bf16.msra.mxu1 %v662_v50 }
 0x11b   :  { %664 = vmatprep.subr.bf16.mxu1 %v699_v5 }
 0x11e   :  { %666 = vmatpush3.bf16.msra.mxu1 %v665_v53 }
 0x1e4   :  { %v355_v55 = vpop.f32.mrb[4].mxu1 }
 0x1e5   :  { %v356_v56 = vadd.f32 %v477_v54, %v355_v55  ;;  %v583_v57 = vpop.f32.mrb[5].mxu1 }
 0x1e7   :  { %v359_v58 = vmax.f32 %v356_v56, 0.0 }
 0x1e9   :  { %601 = vmatmul.mubr.msk.f32.vlgmr.msra.gmra.mrb[6].mxu1 %vm285_vm2, %v359_v58 }
 0x2bc   :  { %v444_v60 = vpop.f32.mrb[6].mxu1 }
 0x2bd   :  { %v445_v61 = vadd.f32 %v479_v59, %v444_v60  ;;  %v602_v62 = vpop.f32.mrb[7].mxu1 }
 0x2bf   :  { %448 = vmax.xlane.f32.xlu0 %v445_v61 }
 0x34c   :  { %v449_v63 = vpop.xlane.xlu0 %448 }
 0x34d   :  { %v450_v0 = vsub.f32 %v445_v61, %v449_v63 }
 0x34f   :  { %v451_v1 = vmul.f32 1.442695, %v450_v0 }
 0x351   :  { %671 = vpow2.f32 %v451_v1 }
 0x35b   :  { %v672_v2 = vpop.eup %671 }
 0x35c   :  { %453 = vadd.xlane.f32.xlu0 %v672_v2 }
 0x3e9   :  { %v454_v3 = vpop.xlane.xlu0 %453 }
 0x3ea   :  { %673 = vrcp.f32 %v454_v3 }
 0x3f4   :  { %v674_v4 = vpop.eup %673 }
 0x3f5   :  { %v456_v5 = vmul.f32 %v674_v4, %v672_v2 }
 0x3f7   :  { %457 = vst [vmem:[#allocation2] sm:$0xff] %v456_v5 }
 0x3f8   :  { %686 = shalt.err (!%p683_p4)
}
 0x3f9   :  { %s687_s16 = scalar_lea.hbm %s979_s7, 128 }
 0x3fa   :  { %p688_p5 = scmp.ne.s32.totalorder %s979_s7, %s687_s16  ;;  %p691_p6 = scmp.lt.u32.totalorder %s687_s16, %s979_s7 }
 0x3fc   :  { %p693_p7 = pnand %p691_p6, %p688_p5 }
 0x3fe   :  { %696 = shalt.err (!%p693_p7)
}
 0x3ff   :  { %467 = dma.vmem_to_hbm [thread:$0]  %s465_s5, 128, %s979_s7, [#allocation3]  }
 0x400   :  { %697 = dma.done.wait [#allocation3], 128  }
 0x401   :  { %698 = vsyncadd [#allocation3], 4294967168 }
 0x402   :  { %471 = vsyncpa [#allocation3], 1 }

</bundles_post_ra>
